<compile_context>
chip_gen: v7x
topology: tpu7x:2x2x1
jax: 0.10.0
libtpu: 0.0.40
codegen_flags: <defaults>
</compile_context>

<pallas_src>
import jax
import jax.numpy as jnp
from jax.experimental import pallas as pl
from jax.experimental.pallas import tpu as pltpu

HIDDEN = 1000
HIDDEN_PAD = 1024          # 1000 -> 1024: multiple of 128 lanes; col 1000 = ones lane
NUM_CLASSES = 10
CLASS_PAD = 128            # 10 -> 128: lane-dense logits / unmasked stores
NEG_PAD = -1.0e30          # padded-class "bias": exp(pad - m) underflows to 0 in LSE


def _round_up(n, m):
    return ((n + m - 1) // m) * m


def mlp_logsoftmax_kernel(x_ref, w1_ref, w2_ref, out_ref):
    # Layer 1: [TB, K_PAD] bf16 @ [K_PAD, 1024] bf16 -> f32.  The constant-1 bias
    # lane of x times the b1 row of W1 supplies the bias; ReLU in f32.
    h = jnp.dot(x_ref[...], w1_ref[...], preferred_element_type=jnp.float32)
    h = jnp.maximum(h, 0.0)

    # Layer 2: [TB, 1024] bf16 @ [1024, 128] bf16 -> f32.  Hidden lane 1000 is the
    # constant 1.0; its W2 row carries b2 for real classes and -1e30 for padded
    # classes, so padded logits never affect max / LSE.
    logits = jnp.dot(h.astype(jnp.bfloat16), w2_ref[...],
                     preferred_element_type=jnp.float32)

    # Numerically stable log-softmax over the full 128-lane class dim (f32).
    m = jnp.max(logits, axis=-1, keepdims=True)
    z = logits - m
    lse = jnp.log(jnp.sum(jnp.exp(z), axis=-1, keepdims=True))
    out_ref[...] = z - lse


def pack_params(input_dim, w1, b1, w2, b2):
    """Fold biases into padded bf16 weight slabs.

    w1: [input_dim, 1000], b1: [1000], w2: [1000, 10], b2: [10]  (f32 masters).
    Returns (w1p [K_PAD, 1024] bf16, w2p [1024, 128] bf16, k_pad, bias_lane).
    """
    k_pad = _round_up(input_dim + 1, 128)   # +1 for the constant-1 bias lane
    bias_lane = input_dim

    w1p = jnp.zeros((k_pad, HIDDEN_PAD), jnp.float32)
    w1p = w1p.at[:input_dim, :HIDDEN].set(w1)
    w1p = w1p.at[bias_lane, :HIDDEN].set(b1)        # b1 via the bias lane
    w1p = w1p.at[bias_lane, HIDDEN].set(1.0)        # makes hidden lane 1000 == 1.0
    w1p = w1p.astype(jnp.bfloat16)

    w2p = jnp.zeros((HIDDEN_PAD, CLASS_PAD), jnp.float32)
    w2p = w2p.at[:HIDDEN, :NUM_CLASSES].set(w2)
    w2p = w2p.at[HIDDEN, :NUM_CLASSES].set(b2)      # b2 via the ones hidden lane
    w2p = w2p.at[HIDDEN, NUM_CLASSES:].set(NEG_PAD) # padded-class logits -> -1e30
    w2p = w2p.astype(jnp.bfloat16)

    return w1p, w2p, k_pad, bias_lane


def mlp_forward(x, w1p, w2p, *, input_dim):
    """x: [B, input_dim] f32; packed params from pack_params(). Returns [B, 10] f32."""
    B = x.shape[0]
    k_pad = w1p.shape[0]

    # Batch tile: multiple of 16 (bf16 LHS sublane packing), capped at 256.
    TB = min(256, _round_up(B, 16))
    B_pad = _round_up(B, TB)
    grid = (B_pad // TB,)

    # Pad batch + K, install the constant-1 bias lane, pre-cast to bf16.
    xp = jnp.zeros((B_pad, k_pad), jnp.float32)
    xp = xp.at[:B, :input_dim].set(x)
    xp = xp.at[:, input_dim].set(1.0)
    xp = xp.astype(jnp.bfloat16)

    # Resident-weight VMEM sanity check (see header TODO for the K-tiled path).
    weight_bytes = w1p.size * w1p.dtype.itemsize + w2p.size * w2p.dtype.itemsize
    assert weight_bytes < 24 * 1024 * 1024, "weights exceed resident-VMEM budget"

    flops = 2 * B_pad * (k_pad * HIDDEN_PAD + HIDDEN_PAD * CLASS_PAD)
    bytes_accessed = (
        xp.size * xp.dtype.itemsize
        + weight_bytes
        + B_pad * CLASS_PAD * 4
    )
    cost = pl.CostEstimate(
        flops=flops,
        transcendentals=B_pad * (CLASS_PAD + 1),   # exp per lane + log per row
        bytes_accessed=bytes_accessed,
    )

    out_pad = pl.pallas_call(
        mlp_logsoftmax_kernel,
        out_shape=jax.ShapeDtypeStruct((B_pad, CLASS_PAD), jnp.float32),
        grid=grid,
        in_specs=[
            pl.BlockSpec((TB, k_pad), lambda i: (i, 0)),            # streamed x tiles
            pl.BlockSpec((k_pad, HIDDEN_PAD), lambda i: (0, 0)),    # resident W1
            pl.BlockSpec((HIDDEN_PAD, CLASS_PAD), lambda i: (0, 0)),# resident W2
        ],
        out_specs=pl.BlockSpec((TB, CLASS_PAD), lambda i: (i, 0)),
        compiler_params=pltpu.CompilerParams(
            dimension_semantics=("parallel",),   # shard batch across v7x's 2 TCs
        ),
        cost_estimate=cost,
    )(xp, w1p, w2p)

    # Drop padded batch rows and padded class lanes.
    return out_pad[:B, :NUM_CLASSES]


def init_params(key, input_dim):
    """PyTorch-Linear-style init (uniform +/- 1/sqrt(fan_in)), f32 masters."""
    k1, k2, k3, k4 = jax.random.split(key, 4)
    bound1 = 1.0 / jnp.sqrt(input_dim)
    bound2 = 1.0 / jnp.sqrt(HIDDEN)
    w1 = jax.random.uniform(k1, (input_dim, HIDDEN), jnp.float32, -bound1, bound1)
    b1 = jax.random.uniform(k2, (HIDDEN,), jnp.float32, -bound1, bound1)
    w2 = jax.random.uniform(k3, (HIDDEN, NUM_CLASSES), jnp.float32, -bound2, bound2)
    b2 = jax.random.uniform(k4, (NUM_CLASSES,), jnp.float32, -bound2, bound2)
    return w1, b1, w2, b2


def reference_forward(x, w1, b1, w2, b2):
    """Pure-JAX reference using the same bf16-quantized operands as the kernel."""
    q = lambda a: a.astype(jnp.bfloat16).astype(jnp.float32)
    h = jnp.maximum(
        jnp.dot(q(x), q(w1), precision=jax.lax.Precision.HIGHEST) + q(b1)[None, :],
        0.0,
    )
    logits = (
        jnp.dot(q(h), q(w2), precision=jax.lax.Precision.HIGHEST) + q(b2)[None, :]
    )
    return jax.nn.log_softmax(logits, axis=1)


if __name__ == "__main__":
    key = jax.random.PRNGKey(0)
    kx, kp = jax.random.split(key)

    B, INPUT_DIM = 8, 32
    x = jax.random.normal(kx, (B, INPUT_DIM), dtype=jnp.float32)

    w1, b1, w2, b2 = init_params(kp, INPUT_DIM)
    w1p, w2p, k_pad, bias_lane = pack_params(INPUT_DIM, w1, b1, w2, b2)

    out = mlp_forward(x, w1p, w2p, input_dim=INPUT_DIM)
    out = jax.block_until_ready(out)

    ref = reference_forward(x, w1, b1, w2, b2)
    assert out.shape == (B, NUM_CLASSES)
    assert bool(jnp.all(jnp.isfinite(out))), "non-finite output"
    assert jnp.allclose(out, ref, atol=1e-2, rtol=1e-2), "mismatch vs reference"
    # log-softmax rows must (approximately) exponentiate-sum to 1
    assert jnp.allclose(jnp.sum(jnp.exp(out), axis=1), 1.0, atol=1e-3)

    print("KERNEL_OK")
</pallas_src>

<mosaic_0001>
module attributes {stable_mosaic.version = 11 : i64} {
  func.func @mlp_logsoftmax_kernel(%arg0: i32, %arg1: memref<16x128xbf16, #tpu.memory_space<vmem>>, %arg2: memref<128x1024xbf16, #tpu.memory_space<vmem>>, %arg3: memref<1024x128xbf16, #tpu.memory_space<vmem>>, %arg4: memref<16x128xf32, #tpu.memory_space<vmem>>) attributes {dimension_semantics = [#tpu.dimension_semantics<parallel>], iteration_bounds = array<i64: 1>, scalar_prefetch = 0 : i64, scratch_operands = 0 : i64, tpu.core_type = #tpu.core_type<tc>, window_params = [{transform_indices = @transform_0, window_bounds = array<i64: 16, 128>}, {pipeline_mode = #tpu.pipeline_mode<synchronous>, transform_indices = @transform_1, window_bounds = array<i64: 128, 1024>}, {pipeline_mode = #tpu.pipeline_mode<synchronous>, transform_indices = @transform_2, window_bounds = array<i64: 1024, 128>}, {transform_indices = @transform_3, window_bounds = array<i64: 16, 128>}]} {
    %c0 = arith.constant 0 : index
    %c0_0 = arith.constant 0 : index
    %0 = vector.load %arg1[%c0, %c0_0] : memref<16x128xbf16, #tpu.memory_space<vmem>>, vector<16x128xbf16>
    %c0_1 = arith.constant 0 : index
    %c0_2 = arith.constant 0 : index
    %1 = vector.load %arg2[%c0_1, %c0_2] : memref<128x1024xbf16, #tpu.memory_space<vmem>>, vector<128x1024xbf16>
    %cst = arith.constant dense<0.000000e+00> : vector<16x1024xf32>
    %2 = tpu.matmul %0, %1, %cst {dimension_numbers = #tpu.dot_dimension_numbers<[1], [0], [0], [1], [0, 0, 1, 1], [], []>} : vector<16x128xbf16>, vector<128x1024xbf16>, vector<16x1024xf32> -> vector<16x1024xf32>
    %cst_3 = arith.constant 0.000000e+00 : f32
    %3 = vector.broadcast %cst_3 : f32 to vector<16x1024xf32>
    %4 = arith.maximumf %2, %3 : vector<16x1024xf32>
    %5 = arith.truncf %4 : vector<16x1024xf32> to vector<16x1024xbf16>
    %c0_4 = arith.constant 0 : index
    %c0_5 = arith.constant 0 : index
    %6 = vector.load %arg3[%c0_4, %c0_5] : memref<1024x128xbf16, #tpu.memory_space<vmem>>, vector<1024x128xbf16>
    %cst_6 = arith.constant dense<0.000000e+00> : vector<16x128xf32>
    %7 = tpu.matmul %5, %6, %cst_6 {dimension_numbers = #tpu.dot_dimension_numbers<[1], [0], [0], [1], [0, 0, 1, 1], [], []>} : vector<16x1024xbf16>, vector<1024x128xbf16>, vector<16x128xf32> -> vector<16x128xf32>
    %cst_7 = arith.constant dense<0xFF800000> : vector<16xf32>
    %8 = vector.multi_reduction <maximumf>, %7, %cst_7 [1] : vector<16x128xf32> to vector<16xf32>
    %9 = vector.shape_cast %8 : vector<16xf32> to vector<16x1xf32>
    %10 = vector.broadcast %9 : vector<16x1xf32> to vector<16x128xf32>
    %11 = arith.subf %7, %10 : vector<16x128xf32>
    %12 = math.exp %11 : vector<16x128xf32>
    %cst_8 = arith.constant dense<0.000000e+00> : vector<16xf32>
    %13 = vector.multi_reduction <add>, %12, %cst_8 [1] : vector<16x128xf32> to vector<16xf32>
    %14 = vector.shape_cast %13 : vector<16xf32> to vector<16x1xf32>
    %15 = math.log %14 : vector<16x1xf32>
    %16 = vector.broadcast %15 : vector<16x1xf32> to vector<16x128xf32>
    %17 = arith.subf %11, %16 : vector<16x128xf32>
    %c0_9 = arith.constant 0 : index
    %c0_10 = arith.constant 0 : index
    %18 = vector.load %arg4[%c0_9, %c0_10] : memref<16x128xf32, #tpu.memory_space<vmem>>, vector<16x128xf32>
    tpu.vector_store %arg4[%c0_9, %c0_10], %17 {strides = array<i32>} : memref<16x128xf32, #tpu.memory_space<vmem>>, vector<16x128xf32>,
    return
  }
  func.func @transform_0(%arg0: i32) -> (i32, i32) {
    %c0_i32 = arith.constant 0 : i32
    %c0_i32_0 = arith.constant 0 : i32
    return %arg0, %c0_i32 : i32, i32
  }
  func.func @transform_1(%arg0: i32) -> (i32, i32) {
    %c0_i32 = arith.constant 0 : i32
    %c0_i32_0 = arith.constant 0 : i32
    %c0_i32_1 = arith.constant 0 : i32
    return %c0_i32, %c0_i32_0 : i32, i32
  }
  func.func @transform_2(%arg0: i32) -> (i32, i32) {
    %c0_i32 = arith.constant 0 : i32
    %c0_i32_0 = arith.constant 0 : i32
    %c0_i32_1 = arith.constant 0 : i32
    return %c0_i32, %c0_i32_0 : i32, i32
  }
  func.func @transform_3(%arg0: i32) -> (i32, i32) {
    %c0_i32 = arith.constant 0 : i32
    %c0_i32_0 = arith.constant 0 : i32
    return %arg0, %c0_i32 : i32, i32
  }
}

</mosaic_0001>

<bundles_post_ra>
// kernel: tpu_custom_call.1
= control target key start
LH: loop header
LB: loop body
LE: loop exit
PB: predicated region body
PF: predicated region fallthrough
CT: control target
= control target key end

     0   :  { %8 = vsyncpa [#allocation3], 0  ;;  %s1845_s0 = inlined_call_operand.hbm [shape: bf16[16,128], index: 0, kind: input, shape index: {}]   ;;  %s1846_s1 = inlined_call_operand.hbm [shape: bf16[128,1024], index: 1, kind: input, shape index: {}]   ;;  %s1847_s2 = inlined_call_operand.hbm [shape: bf16[1024,128], index: 2, kind: input, shape index: {}]   ;;  %s1848_s3 = inlined_call_operand.hbm [shape: f32[16,128], index: 3, kind: output, shape index: {}]  }
   0x1   :  { %9 = vsyncpa [#allocation6], 0 }
   0x2   :  { %10 = vsyncpa [#allocation4], 0  ;;  %s1756_s12 = smov [#allocation5]   ;;  %s1662_s16 = scalar_lea.hbm %s1846_s1, 8192 }
   0x3   :  { %s28_s13 = sshll.u32 %s1756_s12, 4  ;;  %p1663_p0 = scmp.ne.s32.totalorder %s1846_s1, %s1662_s16  ;;  %s29_s13 = int_to_ptr.vmem [resolvable:$true] %s28_s13 }
   0x4   :  { %p1666_p1 = scmp.lt.u32.totalorder %s1662_s16, %s1846_s1 }
   0x6   :  { %p1668_p2 = pnand %p1666_p1, %p1663_p0 }
   0x8   :  { %1671 = shalt.err (!%p1668_p2)
}
   0x9   :  { %s1672_s21 = scalar_lea.vmem %s29_s13, 8192  ;;  %p1677_p4 = scmp.lt.s32.totalorder %s29_s13, %s29_s13 }
   0xa   :  { %p1673_p3 = scmp.ne.s32.totalorder %s29_s13, %s1672_s21  ;;  %p1678_p5 = scmp.lt.s32.totalorder %s1672_s21, %s1672_s21 }
   0xc   :  { %p1679_p6 = por %p1678_p5, %p1677_p4 }
   0xe   :  { %p1680_p7 = pnand %p1679_p6, %p1673_p3 }
  0x10   :  { %1683 = shalt.err (!%p1680_p7)
}
  0x11   :  { %s1757_s22 = smov 512   ;;  %s1758_s23 = smov 32  }
  0x12   :  { %34 = dma.hbm_to_vmem [thread:$0]  %s1846_s1, 8192, %s29_s13, [#allocation6], %s1757_s22, %s1757_s22, %s1758_s23  }
  0x13   :  { %s1759_s26 = smov [#allocation2]   ;;  %s1684_s30 = scalar_lea.hbm %s1845_s0, 128 }
  0x14   :  { %s16_s27 = sshll.u32 %s1759_s26, 4  ;;  %p1685_p8 = scmp.ne.s32.totalorder %s1845_s0, %s1684_s30  ;;  %s17_s27 = int_to_ptr.vmem [resolvable:$true] %s16_s27 }
  0x15   :  { %p1688_p9 = scmp.lt.u32.totalorder %s1684_s30, %s1845_s0 }
  0x17   :  { %p1690_p10 = pnand %p1688_p9, %p1685_p8 }
  0x19   :  { %1693 = shalt.err (!%p1690_p10)
}
  0x1a   :  { %s1694_s8 = scalar_lea.vmem %s17_s27, 128  ;;  %p1699_p12 = scmp.lt.s32.totalorder %s17_s27, %s17_s27 }
  0x1b   :  { %p1695_p11 = scmp.ne.s32.totalorder %s17_s27, %s1694_s8  ;;  %p1700_p13 = scmp.lt.s32.totalorder %s1694_s8, %s1694_s8 }
  0x1d   :  { %p1701_p0 = por %p1700_p13, %p1699_p12 }
  0x1f   :  { %p1702_p1 = pnand %p1701_p0, %p1695_p11 }
  0x21   :  { %1705 = shalt.err (!%p1702_p1)
}
  0x22   :  { %s1760_s1 = smov 64   ;;  %s1761_s9 = smov 4  }
  0x23   :  { %22 = dma.hbm_to_vmem [thread:$0]  %s1845_s0, 128, %s17_s27, [#allocation3], %s1760_s1, %s1760_s1, %s1761_s9  }
  0x24   :  { %s1762_s12 = smov [#allocation7]   ;;  %s1706_s16 = scalar_lea.hbm %s1847_s2, 8192 }
  0x25   :  { %s40_s13 = sshll.u32 %s1762_s12, 4  ;;  %p1707_p2 = scmp.ne.s32.totalorder %s1847_s2, %s1706_s16  ;;  %s41_s13 = int_to_ptr.vmem [resolvable:$true] %s40_s13 }
  0x26   :  { %p1710_p3 = scmp.lt.u32.totalorder %s1706_s16, %s1847_s2 }
  0x28   :  { %p1712_p4 = pnand %p1710_p3, %p1707_p2 }
  0x2a   :  { %1715 = shalt.err (!%p1712_p4)
}
  0x2b   :  { %s1716_s21 = scalar_lea.vmem %s41_s13, 8192  ;;  %p1721_p6 = scmp.lt.s32.totalorder %s41_s13, %s41_s13 }
  0x2c   :  { %p1717_p5 = scmp.ne.s32.totalorder %s41_s13, %s1716_s21  ;;  %p1722_p7 = scmp.lt.s32.totalorder %s1716_s21, %s1716_s21 }
  0x2e   :  { %p1723_p8 = por %p1722_p7, %p1721_p6 }
  0x30   :  { %p1724_p9 = pnand %p1723_p8, %p1717_p5 }
  0x32   :  { %1727 = shalt.err (!%p1724_p9)
}
  0x33   :  { %46 = dma.hbm_to_vmem [thread:$0]  %s1847_s2, 8192, %s41_s13, [#allocation6], %s1760_s1, %s1760_s1, %s1761_s9  }
  0x34   :  { %1750 = dma.done.wait [#allocation3], 128  }
  0x35   :  { %1751 = vsyncadd [#allocation3], 4294967168 }
  0x36   :  { %1752 = dma.done.wait [#allocation6], 16384  }
  0x37   :  { %1753 = vsyncadd [#allocation6], 4294950912  ;;  %v1763_v0 = vmov 0   ;;  %v59_v1 = vld [vmem:[#allocation5] sm:$0xff]  ;;  %v60_v3 = vld [vmem:[#allocation5 + $0x8] sm:$0xff]  ;;  %s1764_s2 = smov [#allocation8]  }
  0x38   :  { %481 = vmatprep.mubr.bf16.mxu0 %v1763_v0  ;;  %524 = vmatprep.mubr.bf16.mxu1 %v1763_v0  ;;  %v63_v2 = vld [vmem:[#allocation5 + $0x20] sm:$0xff]  ;;  %v64_v5 = vld [vmem:[#allocation5 + $0x28] sm:$0xff]  ;;  %v61_v60 = vld [vmem:[#allocation5 + $0x10] sm:$0xff]  ;;  %s1348_s23 = sshll.u32 %s1764_s2, 4  ;;  %s1349_s23 = int_to_ptr.vmem [resolvable:$true] %s1348_s23 }
  0x39   :  { %v1363_v4 = vcombine.high %v59_v1, %v63_v2  ;;  %v1362_v6 = vcombine.low %v59_v1, %v63_v2  ;;  %v67_v7 = vld [vmem:[#allocation5 + $0x40] sm:$0xff]  ;;  %v1365_v9 = vcombine.high %v60_v3, %v64_v5  ;;  %v1364_v10 = vcombine.low %v60_v3, %v64_v5  ;;  %v68_v12 = vld [vmem:[#allocation5 + $0x48] sm:$0xff]  ;;  %v65_v63 = vld [vmem:[#allocation5 + $0x30] sm:$0xff]  ;;  %s1728_s24 = scalar_lea.vmem %s1349_s23, 256  ;;  %p1733_p11 = scmp.lt.s32.totalorder %s1349_s23, %s1349_s23 }
  0x3a   :  { %v71_v8 = vld [vmem:[#allocation5 + $0x60] sm:$0xff]  ;;  %v72_v13 = vld [vmem:[#allocation5 + $0x68] sm:$0xff]  ;;  %v62_v2 = vld [vmem:[#allocation5 + $0x18] sm:$0xff]  ;;  %p1729_p10 = scmp.ne.s32.totalorder %s1349_s23, %s1728_s24  ;;  %p1734_p12 = scmp.lt.s32.totalorder %s1728_s24, %s1728_s24 }
  0x3b   :  { %v1371_v11 = vcombine.high %v67_v7, %v71_v8  ;;  %v75_v14 = vld [vmem:[#allocation5 + $0x80] sm:$0xff]  ;;  %449 = vmatprep.subr.bf16.mxu0 %v1363_v4  ;;  %v1373_v15 = vcombine.high %v68_v12, %v72_v13  ;;  %v76_v17 = vld [vmem:[#allocation5 + $0x88] sm:$0xff]  ;;  %492 = vmatprep.subr.bf16.mxu1 %v1365_v9  ;;  %v1370_v19 = vcombine.low %v67_v7, %v71_v8  ;;  %v66_v3 = vld [vmem:[#allocation5 + $0x38] sm:$0xff] }
  0x3c   :  { %v79_v16 = vld [vmem:[#allocation5 + $0xa0] sm:$0xff]  ;;  %v80_v18 = vld [vmem:[#allocation5 + $0xa8] sm:$0xff]  ;;  %450 = vmatpush1.bf16.msra.mxu0 %v1362_v6  ;;  %493 = vmatpush1.bf16.msra.mxu1 %v1364_v10  ;;  %v1372_v20 = vcombine.low %v68_v12, %v72_v13  ;;  %v69_v5 = vld [vmem:[#allocation5 + $0x50] sm:$0xff]  ;;  %v1367_v8 = vcombine.high %v61_v60, %v65_v63  ;;  %v1369_v10 = vcombine.high %v62_v2, %v66_v3  ;;  %p1735_p13 = por %p1734_p12, %p1733_p11 }
  0x3d   :  { %451 = vmatprep.subr.bf16.mxu0 %v1371_v11  ;;  %v1379_v21 = vcombine.high %v75_v14, %v79_v16  ;;  %494 = vmatprep.subr.bf16.mxu1 %v1373_v15  ;;  %v1381_v22 = vcombine.high %v76_v17, %v80_v18  ;;  %v83_v23 = vld [vmem:[#allocation5 + $0xc0] sm:$0xff]  ;;  %v84_v25 = vld [vmem:[#allocation5 + $0xc8] sm:$0xff]  ;;  %v1378_v27 = vcombine.low %v75_v14, %v79_v16  ;;  %v1825_v7 = vld [vmem:[#allocation2] sm:$0xff]  }
  0x3e   :  { %v87_v24 = vld [vmem:[#allocation5 + $0xe0] sm:$0xff]  ;;  %v88_v26 = vld [vmem:[#allocation5 + $0xe8] sm:$0xff]  ;;  %v1380_v28 = vcombine.low %v76_v17, %v80_v18  ;;  %v73_v9 = vld [vmem:[#allocation5 + $0x70] sm:$0xff]  ;;  %v1366_v13 = vcombine.low %v61_v60, %v65_v63  ;;  %v1368_v15 = vcombine.low %v62_v2, %v66_v3  ;;  %p1736_p0 = pnand %p1735_p13, %p1729_p10 }
  0x3f   :  { %v1387_v29 = vcombine.high %v83_v23, %v87_v24  ;;  %v1389_v30 = vcombine.high %v84_v25, %v88_v26  ;;  %v91_v31 = vld [vmem:[#allocation5 + $0x100] sm:$0xff]  ;;  %v92_v33 = vld [vmem:[#allocation5 + $0x108] sm:$0xff]  ;;  %v1386_v35 = vcombine.low %v83_v23, %v87_v24  ;;  %v1388_v36 = vcombine.low %v84_v25, %v88_v26  ;;  %v70_v11 = vld [vmem:[#allocation5 + $0x58] sm:$0xff] }
  0x40   :  { %452 = vmatpush1.bf16.msra.mxu0 %v1370_v19  ;;  %495 = vmatpush1.bf16.msra.mxu1 %v1372_v20  ;;  %v95_v32 = vld [vmem:[#allocation5 + $0x120] sm:$0xff]  ;;  %v96_v34 = vld [vmem:[#allocation5 + $0x128] sm:$0xff]  ;;  %v74_v12 = vld [vmem:[#allocation5 + $0x78] sm:$0xff]  ;;  %v1375_v16 = vcombine.high %v69_v5, %v73_v9 }
  0x41   :  { %453 = vmatprep.subr.bf16.mxu0 %v1379_v21  ;;  %496 = vmatprep.subr.bf16.mxu1 %v1381_v22  ;;  %v1395_v37 = vcombine.high %v91_v31, %v95_v32  ;;  %v1397_v38 = vcombine.high %v92_v33, %v96_v34  ;;  %v99_v39 = vld [vmem:[#allocation5 + $0x140] sm:$0xff]  ;;  %v100_v41 = vld [vmem:[#allocation5 + $0x148] sm:$0xff]  ;;  %v1394_v43 = vcombine.low %v91_v31, %v95_v32  ;;  %v77_v14 = vld [vmem:[#allocation5 + $0x90] sm:$0xff] }
  0x42   :  { %v103_v40 = vld [vmem:[#allocation5 + $0x160] sm:$0xff]  ;;  %v104_v42 = vld [vmem:[#allocation5 + $0x168] sm:$0xff]  ;;  %v1396_v44 = vcombine.low %v92_v33, %v96_v34  ;;  %v81_v17 = vld [vmem:[#allocation5 + $0xb0] sm:$0xff]  ;;  %v1377_v18 = vcombine.high %v70_v11, %v74_v12  ;;  %v1374_v21 = vcombine.low %v69_v5, %v73_v9  ;;  %v1376_v23 = vcombine.low %v70_v11, %v74_v12 }
  0x43   :  { %v1403_v45 = vcombine.high %v99_v39, %v103_v40  ;;  %v1405_v46 = vcombine.high %v100_v41, %v104_v42  ;;  %v107_v47 = vld [vmem:[#allocation5 + $0x180] sm:$0xff]  ;;  %v108_v49 = vld [vmem:[#allocation5 + $0x188] sm:$0xff]  ;;  %v1402_v51 = vcombine.low %v99_v39, %v103_v40  ;;  %v1404_v52 = vcombine.low %v100_v41, %v104_v42  ;;  %v78_v19 = vld [vmem:[#allocation5 + $0x98] sm:$0xff] }
  0x44   :  { %454 = vmatpush1.bf16.msra.mxu0 %v1378_v27  ;;  %497 = vmatpush1.bf16.msra.mxu1 %v1380_v28  ;;  %v111_v48 = vld [vmem:[#allocation5 + $0x1a0] sm:$0xff]  ;;  %v112_v50 = vld [vmem:[#allocation5 + $0x1a8] sm:$0xff]  ;;  %v82_v20 = vld [vmem:[#allocation5 + $0xb8] sm:$0xff]  ;;  %v1383_v24 = vcombine.high %v77_v14, %v81_v17 }
  0x45   :  { %455 = vmatprep.subr.bf16.mxu0 %v1387_v29  ;;  %498 = vmatprep.subr.bf16.mxu1 %v1389_v30  ;;  %v1411_v53 = vcombine.high %v107_v47, %v111_v48  ;;  %v115_v54 = vld [vmem:[#allocation5 + $0x1c0] sm:$0xff]  ;;  %v1413_v56 = vcombine.high %v108_v49, %v112_v50  ;;  %v116_v57 = vld [vmem:[#allocation5 + $0x1c8] sm:$0xff]  ;;  %v1410_v59 = vcombine.low %v107_v47, %v111_v48  ;;  %v85_v22 = vld [vmem:[#allocation5 + $0xd0] sm:$0xff] }
  0x46   :  { %v119_v55 = vld [vmem:[#allocation5 + $0x1e0] sm:$0xff]  ;;  %v120_v58 = vld [vmem:[#allocation5 + $0x1e8] sm:$0xff]  ;;  %v1412_v61 = vcombine.low %v108_v49, %v112_v50  ;;  %v89_v25 = vld [vmem:[#allocation5 + $0xf0] sm:$0xff]  ;;  %v1385_v26 = vcombine.high %v78_v19, %v82_v20  ;;  %v1382_v29 = vcombine.low %v77_v14, %v81_v17  ;;  %v1384_v31 = vcombine.low %v78_v19, %v82_v20 }
  0x47   :  { %v1419_v62 = vcombine.high %v115_v54, %v119_v55  ;;  %v1421_v1 = vcombine.high %v116_v57, %v120_v58  ;;  %v1418_v4 = vcombine.low %v115_v54, %v119_v55  ;;  %v1420_v6 = vcombine.low %v116_v57, %v120_v58  ;;  %v86_v27 = vld [vmem:[#allocation5 + $0xd8] sm:$0xff]  ;;  %v93_v30 = vld [vmem:[#allocation5 + $0x110] sm:$0xff]  ;;  %v1591_v3 = vld [vmem:[#allocation7 + $0xc0] sm:$0xff]  }
  0x48   :  { %456 = vmatpush1.bf16.msra.mxu0 %v1386_v35  ;;  %499 = vmatpush1.bf16.msra.mxu1 %v1388_v36  ;;  %v90_v28 = vld [vmem:[#allocation5 + $0xf8] sm:$0xff]  ;;  %v1391_v32 = vcombine.high %v85_v22, %v89_v25  ;;  %v97_v33 = vld [vmem:[#allocation5 + $0x130] sm:$0xff]  ;;  %v1592_v5 = vld [vmem:[#allocation7] sm:$0xff]  }
  0x49   :  { %457 = vmatprep.subr.bf16.mxu0 %v1395_v37  ;;  %500 = vmatprep.subr.bf16.mxu1 %v1397_v38  ;;  %v1393_v34 = vcombine.high %v86_v27, %v90_v28  ;;  %v94_v35 = vld [vmem:[#allocation5 + $0x118] sm:$0xff]  ;;  %v1390_v37 = vcombine.low %v85_v22, %v89_v25  ;;  %v101_v38 = vld [vmem:[#allocation5 + $0x150] sm:$0xff]  ;;  %v1392_v40 = vcombine.low %v86_v27, %v90_v28  ;;  %v1595_v9 = vld [vmem:[#allocation7 + $0xc8] sm:$0xff]  }
  0x4a   :  { %v98_v36 = vld [vmem:[#allocation5 + $0x138] sm:$0xff]  ;;  %v105_v39 = vld [vmem:[#allocation5 + $0x170] sm:$0xff]  ;;  %v1597_v11 = vld [vmem:[#allocation7 + $0x88] sm:$0xff]  }
  0x4b   :  { %v102_v41 = vld [vmem:[#allocation5 + $0x158] sm:$0xff]  ;;  %v1401_v42 = vcombine.high %v94_v35, %v98_v36  ;;  %v1400_v47 = vcombine.low %v94_v35, %v98_v36  ;;  %v1407_v48 = vcombine.high %v101_v38, %v105_v39  ;;  %v121_v54 = vld [vmem:[#allocation5 + $0x1f0] sm:$0xff]  ;;  %v1606_v20 = vld [vmem:[#allocation7 + $0x60] sm:$0xff]  }
  0x4c   :  { %458 = vmatpush1.bf16.msra.mxu0 %v1394_v43  ;;  %501 = vmatpush1.bf16.msra.mxu1 %v1396_v44  ;;  %v106_v43 = vld [vmem:[#allocation5 + $0x178] sm:$0xff]  ;;  %v1398_v44 = vcombine.low %v93_v30, %v97_v33  ;;  %v1598_v12 = vld [vmem:[#allocation7 + $0x50] sm:$0xff]   ;;  %v1609_v22 = vld [vmem:[#allocation7 + $0xa0] sm:$0xff]  }
  0x4d   :  { %459 = vmatprep.subr.bf16.mxu0 %v1403_v45  ;;  %502 = vmatprep.subr.bf16.mxu1 %v1405_v46  ;;  %v109_v45 = vld [vmem:[#allocation5 + $0x190] sm:$0xff]  ;;  %v110_v49 = vld [vmem:[#allocation5 + $0x198] sm:$0xff]  ;;  %v1408_v55 = vcombine.low %v102_v41, %v106_v43  ;;  %v1612_v25 = vld [vmem:[#allocation7 + $0x28] sm:$0xff]  }
  0x4e   :  { %v113_v46 = vld [vmem:[#allocation5 + $0x1b0] sm:$0xff]  ;;  %v114_v50 = vld [vmem:[#allocation5 + $0x1b8] sm:$0xff]  ;;  %v1622_v35 = vld [vmem:[#allocation7 + $0x140] sm:$0xff]  }
  0x4f   :  { %v118_v57 = vld [vmem:[#allocation5 + $0x1d8] sm:$0xff]  ;;  %v1414_v60 = vcombine.low %v109_v45, %v113_v46  ;;  %v1600_v14 = vld [vmem:[#allocation7 + $0x10] sm:$0xff]   ;;  %v1623_v36 = vld [vmem:[#allocation7 + $0x1c0] sm:$0xff]  }
  0x50   :  { %460 = vmatpush1.bf16.msra.mxu0 %v1402_v51  ;;  %503 = vmatpush1.bf16.msra.mxu1 %v1404_v52  ;;  %v1409_v51 = vcombine.high %v102_v41, %v106_v43  ;;  %v1406_v52 = vcombine.low %v101_v38, %v105_v39  ;;  %v122_v58 = vld [vmem:[#allocation5 + $0x1f8] sm:$0xff]  ;;  %v1614_v27 = vld [vmem:[#allocation7 + $0x70] sm:$0xff]  }
  0x51   :  { %461 = vmatprep.subr.bf16.mxu0 %v1411_v53  ;;  %504 = vmatprep.subr.bf16.mxu1 %v1413_v56  ;;  %v117_v53 = vld [vmem:[#allocation5 + $0x1d0] sm:$0xff]  ;;  %v1415_v56 = vcombine.high %v109_v45, %v113_v46  ;;  %v1425_v63 = vcombine.high %v118_v57, %v122_v58  ;;  %v1603_v17 = vld [vmem:[#allocation7 + $0xd8] sm:$0xff]  }
  0x52   :  { %v1422_v2 = vcombine.low %v117_v53, %v121_v54  ;;  %v1605_v19 = vld [vmem:[#allocation7 + $0x98] sm:$0xff]   ;;  %v1615_v28 = vld [vmem:[#allocation7 + $0xf0] sm:$0xff]  }
  0x54   :  { %462 = vmatpush1.bf16.msra.mxu0 %v1410_v59  ;;  %505 = vmatpush1.bf16.msra.mxu1 %v1412_v61  ;;  %v1417_v59 = vcombine.high %v110_v49, %v114_v50  ;;  %v1416_v61 = vcombine.low %v110_v49, %v114_v50 }
  0x55   :  { %463 = vmatprep.subr.bf16.mxu0 %v1419_v62  ;;  %506 = vmatprep.subr.bf16.mxu1 %v1421_v1  ;;  %v1423_v62 = vcombine.high %v117_v53, %v121_v54  ;;  %v1590_v1 = vld [vmem:[#allocation7 + $0x40] sm:$0xff]  }
  0x58   :  { %464 = vmatpush1.bf16.msra.mxu0 %v1418_v4  ;;  %507 = vmatpush1.bf16.msra.mxu1 %v1420_v6  ;;  %v1424_v4 = vcombine.low %v118_v57, %v122_v58  ;;  %v1593_v6 = vld [vmem:[#allocation7 + $0x80] sm:$0xff]   ;;  %v1626_v58 = vld [vmem:[#allocation7 + $0x148] sm:$0xff]  }
  0x59   :  { %535 = vmatprep.subr.bf16.mxu0 %v1367_v8  ;;  %578 = vmatprep.subr.bf16.mxu1 %v1369_v10  ;;  %v1594_v8 = vld [vmem:[#allocation7 + $0x48] sm:$0xff]   ;;  %v1625_v57 = vld [vmem:[#allocation7 + $0x180] sm:$0xff]  }
  0x5a   :  { %v1596_v10 = vld [vmem:[#allocation7 + $0x8] sm:$0xff]  }
  0x5b   :  { %482 = vmatmul.mubr.bf16.vlgmr.msra.gmra.mrb[0].mxu0 %v1825_v7  ;;  %525 = vmatmul.mubr.bf16.vlgmr.msra.gmra.mrb[0].mxu1 %v1825_v7 }
  0x5c   :  { %536 = vmatpush1.bf16.msra.mxu0 %v1366_v13  ;;  %579 = vmatpush1.bf16.msra.mxu1 %v1368_v15  ;;  %v1599_v13 = vld [vmem:[#allocation7 + $0xd0] sm:$0xff]  }
  0x5d   :  { %537 = vmatprep.subr.bf16.mxu0 %v1375_v16  ;;  %580 = vmatprep.subr.bf16.mxu1 %v1377_v18  ;;  %v1601_v15 = vld [vmem:[#allocation7 + $0x90] sm:$0xff]   ;;  %v1602_v16 = vld [vmem:[#allocation7 + $0x58] sm:$0xff]  }
  0x5e   :  { %567 = vmatprep.mubr.bf16.mxu0 %v1763_v0  ;;  %610 = vmatprep.mubr.bf16.mxu1 %v1763_v0  ;;  %v1399_v0 = vcombine.high %v93_v30, %v97_v33  ;;  %v1604_v18 = vld [vmem:[#allocation7 + $0x18] sm:$0xff]   ;;  %v1617_v30 = vld [vmem:[#allocation7 + $0xb0] sm:$0xff]  }
  0x5f   :  { %v1620_v33 = vld [vmem:[#allocation7 + $0x38] sm:$0xff]  }
  0x60   :  { %538 = vmatpush1.bf16.msra.mxu0 %v1374_v21  ;;  %581 = vmatpush1.bf16.msra.mxu1 %v1376_v23  ;;  %v1608_v21 = vld [vmem:[#allocation7 + $0x20] sm:$0xff]   ;;  %v1610_v23 = vld [vmem:[#allocation7 + $0x68] sm:$0xff]  }
  0x61   :  { %539 = vmatprep.subr.bf16.mxu0 %v1383_v24  ;;  %582 = vmatprep.subr.bf16.mxu1 %v1385_v26  ;;  %v1611_v24 = vld [vmem:[#allocation7 + $0xe8] sm:$0xff]  }
  0x62   :  { %v1613_v26 = vld [vmem:[#allocation7 + $0xa8] sm:$0xff]  }
  0x64   :  { %540 = vmatpush1.bf16.msra.mxu0 %v1382_v29  ;;  %583 = vmatpush1.bf16.msra.mxu1 %v1384_v31  ;;  %v1616_v29 = vld [vmem:[#allocation7 + $0x30] sm:$0xff]   ;;  %v1618_v31 = vld [vmem:[#allocation7 + $0x78] sm:$0xff]  }
  0x65   :  { %541 = vmatprep.subr.bf16.mxu0 %v1391_v32  ;;  %584 = vmatprep.subr.bf16.mxu1 %v1393_v34  ;;  %v1619_v32 = vld [vmem:[#allocation7 + $0xf8] sm:$0xff]  }
  0x66   :  { %v1621_v34 = vld [vmem:[#allocation7 + $0xb8] sm:$0xff]  }
  0x68   :  { %542 = vmatpush1.bf16.msra.mxu0 %v1390_v37  ;;  %585 = vmatpush1.bf16.msra.mxu1 %v1392_v40 }
  0x69   :  { %543 = vmatprep.subr.bf16.mxu0 %v1399_v0  ;;  %586 = vmatprep.subr.bf16.mxu1 %v1401_v42 }
  0x6c   :  { %544 = vmatpush1.bf16.msra.mxu0 %v1398_v44  ;;  %587 = vmatpush1.bf16.msra.mxu1 %v1400_v47 }
  0x6d   :  { %545 = vmatprep.subr.bf16.mxu0 %v1407_v48  ;;  %588 = vmatprep.subr.bf16.mxu1 %v1409_v51 }
  0x70   :  { %546 = vmatpush1.bf16.msra.mxu0 %v1406_v52  ;;  %589 = vmatpush1.bf16.msra.mxu1 %v1408_v55  ;;  %v1624_v55 = vld [vmem:[#allocation7 + $0x100] sm:$0xff]  }
  0x71   :  { %547 = vmatprep.subr.bf16.mxu0 %v1415_v56  ;;  %590 = vmatprep.subr.bf16.mxu1 %v1417_v59  ;;  %v1627_v59 = vld [vmem:[#allocation7 + $0x1c8] sm:$0xff]  }
  0x74   :  { %548 = vmatpush1.bf16.msra.mxu0 %v1414_v60  ;;  %591 = vmatpush1.bf16.msra.mxu1 %v1416_v61  ;;  %v1628_v60 = vld [vmem:[#allocation7 + $0x108] sm:$0xff]  }
  0x75   :  { %549 = vmatprep.subr.bf16.mxu0 %v1423_v62  ;;  %592 = vmatprep.subr.bf16.mxu1 %v1425_v63  ;;  %v1629_v61 = vld [vmem:[#allocation7 + $0x188] sm:$0xff]   ;;  %v1630_v62 = vld [vmem:[#allocation7 + $0x150] sm:$0xff]  }
  0x76   :  { %v1631_v63 = vld [vmem:[#allocation7 + $0x1d0] sm:$0xff]  }
  0x78   :  { %550 = vmatpush1.bf16.msra.mxu0 %v1422_v2  ;;  %593 = vmatpush1.bf16.msra.mxu1 %v1424_v4  ;;  %v1633_v2 = vld [vmem:[#allocation7 + $0x190] sm:$0xff]   ;;  %v1635_v4 = vld [vmem:[#allocation7 + $0x1d8] sm:$0xff]  }
  0x79   :  { %1490 = vmatprep.subr.bf16.mxu0 %v1590_v1  ;;  %1512 = vmatprep.subr.bf16.mxu1 %v1591_v3  ;;  %v1632_v1 = vld [vmem:[#allocation7 + $0x110] sm:$0xff]   ;;  %v1634_v3 = vld [vmem:[#allocation7 + $0x158] sm:$0xff]  }
  0x7b   :  { %568 = vmatmul.mubr.bf16.vlgmr.msra.gmra.mrb[4].mxu0 %v1825_v7  ;;  %611 = vmatmul.mubr.bf16.vlgmr.msra.gmra.mrb[4].mxu1 %v1825_v7  ;;  %v1607_v7 = vld [vmem:[#allocation7 + $0xe0] sm:$0xff]  }
  0x7c   :  { %1491 = vmatpush3.bf16.msra.mxu0 %v1592_v5  ;;  %1513 = vmatpush3.bf16.msra.mxu1 %v1593_v6  ;;  %v1636_v5 = vld [vmem:[#allocation7 + $0x118] sm:$0xff]  }
  0x7d   :  { %1492 = vmatprep.subr.bf16.mxu0 %v1594_v8  ;;  %1514 = vmatprep.subr.bf16.mxu1 %v1595_v9  ;;  %v1637_v6 = vld [vmem:[#allocation7 + $0x198] sm:$0xff]   ;;  %v1638_v8 = vld [vmem:[#allocation7 + $0x160] sm:$0xff]  }
  0x7e   :  { %v1639_v9 = vld [vmem:[#allocation7 + $0x1e0] sm:$0xff]  }
  0x80   :  { %1493 = vmatpush3.bf16.msra.mxu0 %v1596_v10  ;;  %1515 = vmatpush3.bf16.msra.mxu1 %v1597_v11  ;;  %v1640_v10 = vld [vmem:[#allocation7 + $0x120] sm:$0xff]  }
  0x81   :  { %1494 = vmatprep.subr.bf16.mxu0 %v1598_v12  ;;  %1516 = vmatprep.subr.bf16.mxu1 %v1599_v13  ;;  %v1641_v11 = vld [vmem:[#allocation7 + $0x1a0] sm:$0xff]   ;;  %v1642_v12 = vld [vmem:[#allocation7 + $0x168] sm:$0xff]  }
  0x82   :  { %v1643_v13 = vld [vmem:[#allocation7 + $0x1e8] sm:$0xff]  }
  0x84   :  { %1495 = vmatpush3.bf16.msra.mxu0 %v1600_v14  ;;  %1517 = vmatpush3.bf16.msra.mxu1 %v1601_v15  ;;  %v1644_v14 = vld [vmem:[#allocation7 + $0x128] sm:$0xff]  }
  0x85   :  { %1496 = vmatprep.subr.bf16.mxu0 %v1602_v16  ;;  %1518 = vmatprep.subr.bf16.mxu1 %v1603_v17  ;;  %v1645_v15 = vld [vmem:[#allocation7 + $0x1a8] sm:$0xff]   ;;  %v1646_v16 = vld [vmem:[#allocation7 + $0x170] sm:$0xff]  }
  0x86   :  { %v1647_v17 = vld [vmem:[#allocation7 + $0x1f0] sm:$0xff]  }
  0x88   :  { %1497 = vmatpush3.bf16.msra.mxu0 %v1604_v18  ;;  %1519 = vmatpush3.bf16.msra.mxu1 %v1605_v19  ;;  %v1648_v18 = vld [vmem:[#allocation7 + $0x130] sm:$0xff]  }
  0x89   :  { %1498 = vmatprep.subr.bf16.mxu0 %v1606_v20  ;;  %1520 = vmatprep.subr.bf16.mxu1 %v1607_v7  ;;  %v1649_v19 = vld [vmem:[#allocation7 + $0x1b0] sm:$0xff]   ;;  %v1650_v20 = vld [vmem:[#allocation7 + $0x178] sm:$0xff]  }
  0x8c   :  { %1499 = vmatpush3.bf16.msra.mxu0 %v1608_v21  ;;  %1521 = vmatpush3.bf16.msra.mxu1 %v1609_v22  ;;  %v1651_v21 = vld [vmem:[#allocation7 + $0x1f8] sm:$0xff]  }
  0x8d   :  { %1500 = vmatprep.subr.bf16.mxu0 %v1610_v23  ;;  %1522 = vmatprep.subr.bf16.mxu1 %v1611_v24 }
  0x90   :  { %1501 = vmatpush3.bf16.msra.mxu0 %v1612_v25  ;;  %1523 = vmatpush3.bf16.msra.mxu1 %v1613_v26 }
  0x91   :  { %1502 = vmatprep.subr.bf16.mxu0 %v1614_v27  ;;  %1524 = vmatprep.subr.bf16.mxu1 %v1615_v28  ;;  %v1652_v27 = vld [vmem:[#allocation7 + $0x138] sm:$0xff]  }
  0x94   :  { %1503 = vmatpush3.bf16.msra.mxu0 %v1616_v29  ;;  %1525 = vmatpush3.bf16.msra.mxu1 %v1617_v30 }
  0x95   :  { %1504 = vmatprep.subr.bf16.mxu0 %v1618_v31  ;;  %1526 = vmatprep.subr.bf16.mxu1 %v1619_v32 }
  0x98   :  { %1505 = vmatpush3.bf16.msra.mxu0 %v1620_v33  ;;  %1527 = vmatpush3.bf16.msra.mxu1 %v1621_v34  ;;  %v1653_v33 = vld [vmem:[#allocation7 + $0x1b8] sm:$0xff]  }
  0x99   :  { %1534 = vmatprep.subr.bf16.mxu0 %v1622_v35  ;;  %1556 = vmatprep.subr.bf16.mxu1 %v1623_v36 }
 0x12e   :  { %v483_v37 = vpop.f32.mrb[0].mxu0  ;;  %v526_v39 = vpop.f32.mrb[0].mxu1 }
 0x12f   :  { %v621_v38 = vmax.f32 %v483_v37, 0.0  ;;  %v485_v40 = vpop.f32.mrb[1].mxu0  ;;  %v623_v0 = vmax.f32 %v526_v39, 0.0  ;;  %v528_v41 = vpop.f32.mrb[1].mxu1 }
 0x130   :  { %v487_v42 = vpop.f32.mrb[2].mxu0  ;;  %v624_v43 = vmax.f32 %v528_v41, 0.0  ;;  %v530_v45 = vpop.f32.mrb[2].mxu1  ;;  %v622_v47 = vmax.f32 %v485_v40, 0.0 }
 0x131   :  { %v629_v44 = vmax.f32 %v487_v42, 0.0  ;;  %v489_v46 = vpop.f32.mrb[3].mxu0  ;;  %v631_v48 = vmax.f32 %v530_v45, 0.0  ;;  %v532_v50 = vpop.f32.mrb[3].mxu1 }
 0x132   :  { %v630_v49 = vmax.f32 %v489_v46, 0.0  ;;  %v632_v52 = vmax.f32 %v532_v50, 0.0 }
 0x133   :  { %v637_v51 = vpack.c.bf16 %v629_v44, %v621_v38  ;;  %v639_v53 = vpack.c.bf16 %v631_v48, %v623_v0 }
 0x134   :  { %v638_v54 = vpack.c.bf16 %v630_v49, %v622_v47  ;;  %v640_v56 = vpack.c.bf16 %v632_v52, %v624_v43 }
 0x136   :  { %1189 = vmatprep.mubr.bf16.mxu0 %v638_v54  ;;  %1230 = vmatprep.mubr.bf16.mxu1 %v640_v56 }
 0x137   :  { %1190 = vmatmul.mubr.bf16.vlgmr.msra.gmra.mrb[8].mxu0 %v637_v51  ;;  %1231 = vmatmul.mubr.bf16.vlgmr.msra.gmra.mrb[8].mxu1 %v639_v53 }
 0x138   :  { %1535 = vmatpush3.bf16.msra.mxu0 %v1624_v55  ;;  %1557 = vmatpush3.bf16.msra.mxu1 %v1625_v57 }
 0x139   :  { %1536 = vmatprep.subr.bf16.mxu0 %v1626_v58  ;;  %1558 = vmatprep.subr.bf16.mxu1 %v1627_v59 }
 0x13c   :  { %1537 = vmatpush3.bf16.msra.mxu0 %v1628_v60  ;;  %1559 = vmatpush3.bf16.msra.mxu1 %v1629_v61 }
 0x13d   :  { %1538 = vmatprep.subr.bf16.mxu0 %v1630_v62  ;;  %1560 = vmatprep.subr.bf16.mxu1 %v1631_v63 }
 0x140   :  { %1539 = vmatpush3.bf16.msra.mxu0 %v1632_v1  ;;  %1561 = vmatpush3.bf16.msra.mxu1 %v1633_v2 }
 0x141   :  { %1540 = vmatprep.subr.bf16.mxu0 %v1634_v3  ;;  %1562 = vmatprep.subr.bf16.mxu1 %v1635_v4 }
 0x144   :  { %1541 = vmatpush3.bf16.msra.mxu0 %v1636_v5  ;;  %1563 = vmatpush3.bf16.msra.mxu1 %v1637_v6 }
 0x145   :  { %1542 = vmatprep.subr.bf16.mxu0 %v1638_v8  ;;  %1564 = vmatprep.subr.bf16.mxu1 %v1639_v9 }
 0x148   :  { %1543 = vmatpush3.bf16.msra.mxu0 %v1640_v10  ;;  %1565 = vmatpush3.bf16.msra.mxu1 %v1641_v11 }
 0x149   :  { %1544 = vmatprep.subr.bf16.mxu0 %v1642_v12  ;;  %1566 = vmatprep.subr.bf16.mxu1 %v1643_v13 }
 0x14c   :  { %1545 = vmatpush3.bf16.msra.mxu0 %v1644_v14  ;;  %1567 = vmatpush3.bf16.msra.mxu1 %v1645_v15 }
 0x14d   :  { %1546 = vmatprep.subr.bf16.mxu0 %v1646_v16  ;;  %1568 = vmatprep.subr.bf16.mxu1 %v1647_v17 }
 0x14e   :  { %v569_v7 = vpop.f32.mrb[4].mxu0  ;;  %v612_v22 = vpop.f32.mrb[4].mxu1 }
 0x14f   :  { %v571_v23 = vpop.f32.mrb[5].mxu0  ;;  %v627_v24 = vmax.f32 %v612_v22, 0.0  ;;  %v614_v25 = vpop.f32.mrb[5].mxu1  ;;  %v625_v28 = vmax.f32 %v569_v7, 0.0 }
 0x150   :  { %v573_v26 = vpop.f32.mrb[6].mxu0  ;;  %1547 = vmatpush3.bf16.msra.mxu0 %v1648_v18  ;;  %v628_v29 = vmax.f32 %v614_v25, 0.0  ;;  %v616_v31 = vpop.f32.mrb[6].mxu1  ;;  %1569 = vmatpush3.bf16.msra.mxu1 %v1649_v19  ;;  %v626_v34 = vmax.f32 %v571_v23, 0.0 }
 0x151   :  { %v633_v30 = vmax.f32 %v573_v26, 0.0  ;;  %v575_v32 = vpop.f32.mrb[7].mxu0  ;;  %1548 = vmatprep.subr.bf16.mxu0 %v1650_v20  ;;  %v635_v35 = vmax.f32 %v616_v31, 0.0  ;;  %v618_v37 = vpop.f32.mrb[7].mxu1  ;;  %1570 = vmatprep.subr.bf16.mxu1 %v1651_v21 }
 0x152   :  { %v634_v36 = vmax.f32 %v575_v32, 0.0  ;;  %v636_v39 = vmax.f32 %v618_v37, 0.0 }
 0x153   :  { %v641_v38 = vpack.c.bf16 %v633_v30, %v625_v28  ;;  %v643_v40 = vpack.c.bf16 %v635_v35, %v627_v24 }
 0x154   :  { %v642_v0 = vpack.c.bf16 %v634_v36, %v626_v34  ;;  %1549 = vmatpush3.bf16.msra.mxu0 %v1652_v27  ;;  %v644_v41 = vpack.c.bf16 %v636_v39, %v628_v29  ;;  %1571 = vmatpush3.bf16.msra.mxu1 %v1653_v33 }
 0x156   :  { %1271 = vmatprep.mubr.bf16.mxu0 %v642_v0  ;;  %1312 = vmatprep.mubr.bf16.mxu1 %v644_v41 }
 0x157   :  { %1272 = vmatmul.mubr.bf16.vlgmr.msra.gmra.mrb[12].mxu0 %v641_v38  ;;  %1313 = vmatmul.mubr.bf16.vlgmr.msra.gmra.mrb[12].mxu1 %v643_v40 }
 0x20a   :  { %v1506_v42 = vpop.f32.mrb[8].mxu0  ;;  %v1528_v43 = vpop.f32.mrb[8].mxu1 }
 0x20b   :  { %v1507_v44 = vpop.f32.mrb[9].mxu0  ;;  %v1529_v46 = vpop.f32.mrb[9].mxu1 }
 0x20c   :  { %v1508_v45 = vadd.f32 %v1507_v44, %v1506_v42  ;;  %v1509_v47 = vpop.f32.mrb[10].mxu0  ;;  %v1530_v48 = vadd.f32 %v1529_v46, %v1528_v43  ;;  %v1531_v49 = vpop.f32.mrb[10].mxu1 }
 0x20d   :  { %v1510_v50 = vpop.f32.mrb[11].mxu0  ;;  %v1532_v52 = vpop.f32.mrb[11].mxu1 }
 0x20e   :  { %v1511_v51 = vadd.f32 %v1510_v50, %v1509_v47  ;;  %v1233_v53 = vadd.f32 %v1530_v48, %v1508_v45  ;;  %v1533_v54 = vadd.f32 %v1532_v52, %v1531_v49 }
 0x210   :  { %v1236_v55 = vadd.f32 %v1533_v54, %v1511_v51 }
 0x22a   :  { %v1550_v56 = vpop.f32.mrb[12].mxu0  ;;  %v1572_v57 = vpop.f32.mrb[12].mxu1 }
 0x22b   :  { %v1551_v58 = vpop.f32.mrb[13].mxu0  ;;  %v1573_v60 = vpop.f32.mrb[13].mxu1 }
 0x22c   :  { %v1552_v59 = vadd.f32 %v1551_v58, %v1550_v56  ;;  %v1553_v61 = vpop.f32.mrb[14].mxu0  ;;  %v1574_v62 = vadd.f32 %v1573_v60, %v1572_v57  ;;  %v1575_v63 = vpop.f32.mrb[14].mxu1 }
 0x22d   :  { %v1554_v1 = vpop.f32.mrb[15].mxu0  ;;  %v1576_v4 = vpop.f32.mrb[15].mxu1 }
 0x22e   :  { %v1274_v2 = vadd.f32 %v1552_v59, %v1233_v53  ;;  %v1555_v3 = vadd.f32 %v1554_v1, %v1553_v61  ;;  %v1577_v5 = vadd.f32 %v1576_v4, %v1575_v63 }
 0x230   :  { %v1277_v6 = vadd.f32 %v1555_v3, %v1236_v55  ;;  %v1315_v8 = vadd.f32 %v1574_v62, %v1274_v2 }
 0x232   :  { %1321 = vmax.xlane.f32.xlu0 %v1315_v8  ;;  %v1318_v9 = vadd.f32 %v1577_v5, %v1277_v6 }
 0x236   :  { %1323 = vmax.xlane.f32.xlu0 %v1318_v9 }
 0x2bf   :  { %v1322_v10 = vpop.xlane.xlu0 %1321 }
 0x2c0   :  { %v1325_v11 = vsub.f32 %v1315_v8, %v1322_v10 }
 0x2c2   :  { %v1327_v12 = vmul.f32 1.442695, %v1325_v11 }
 0x2c3   :  { %v1324_v13 = vpop.xlane.xlu0 %1323 }
 0x2c4   :  { %v1326_v14 = vsub.f32 %v1318_v9, %v1324_v13  ;;  %1654 = vpow2.f32 %v1327_v12 }
 0x2c6   :  { %v1329_v15 = vmul.f32 1.442695, %v1326_v14 }
 0x2c8   :  { %1656 = vpow2.f32 %v1329_v15 }
 0x2ce   :  { %v1655_v16 = vpop.eup %1654 }
 0x2cf   :  { %1331 = vadd.xlane.f32.xlu1 %v1655_v16 }
 0x2d2   :  { %v1657_v17 = vpop.eup %1656 }
 0x2d3   :  { %1333 = vadd.xlane.f32.xlu1 %v1657_v17 }
 0x35c   :  { %v1332_v18 = vpop.xlane.xlu1 %1331 }
 0x35d   :  { %1658 = vlog2.f32 %v1332_v18 }
 0x360   :  { %v1334_v19 = vpop.xlane.xlu1 %1333 }
 0x361   :  { %1660 = vlog2.f32 %v1334_v19 }
 0x367   :  { %v1659_v20 = vpop.eup %1658 }
 0x368   :  { %v1336_v7 = vmul.f32 0.6931472, %v1659_v20 }
 0x36a   :  { %v1339_v21 = vsub.f32 %v1325_v11, %v1336_v7 }
 0x36b   :  { %v1661_v22 = vpop.eup %1660 }
 0x36c   :  { %1341 = vst [vmem:[#allocation8] sm:$0xff] %v1339_v21  ;;  %v1338_v23 = vmul.f32 0.6931472, %v1661_v22 }
 0x36e   :  { %v1340_v24 = vsub.f32 %v1326_v14, %v1338_v23 }
 0x370   :  { %1342 = vst [vmem:[#allocation8 + $0x8] sm:$0xff] %v1340_v24 }
 0x371   :  { %1739 = shalt.err (!%p1736_p0)
}
 0x372   :  { %s1740_s27 = scalar_lea.hbm %s1848_s3, 256 }
 0x373   :  { %p1741_p1 = scmp.ne.s32.totalorder %s1848_s3, %s1740_s27  ;;  %p1744_p2 = scmp.lt.u32.totalorder %s1740_s27, %s1848_s3 }
 0x375   :  { %p1746_p3 = pnand %p1744_p2, %p1741_p1 }
 0x377   :  { %1749 = shalt.err (!%p1746_p3)
}
 0x378   :  { %s1765_s5 = smov 128   ;;  %s1766_s6 = smov 8  }
 0x379   :  { %1354 = dma.vmem_to_hbm [thread:$0]  %s1349_s23, 256, %s1848_s3, [#allocation4], %s1765_s5, %s1765_s5, %s1766_s6  }
 0x37a   :  { %1754 = dma.done.wait [#allocation4], 256  }
 0x37b   :  { %1755 = vsyncadd [#allocation4], 4294967040 }
 0x37c   :  { %1358 = vsyncpa [#allocation3], 1 }
 0x37d   :  { %1359 = vsyncpa [#allocation6], 1 }
 0x37e   :  { %1360 = vsyncpa [#allocation4], 1 }

</bundles_post_ra>
